<compile_context>
chip_gen: v5e
topology: v5e:2x2
jax: 0.10.0
libtpu: 0.0.40
codegen_flags: <defaults>
</compile_context>

<pallas_src>
import functools

import jax
import jax.numpy as jnp
from jax.experimental import pallas as pl
from jax.experimental.pallas import tpu as pltpu


def _flow_kernel(x_ref, w1t_ref, b1_ref, w2t_ref, b2_ref,
                 theta_ref, jac_ref, theta_vmem, *, batch, latent):
    layer = pl.program_id(0)

    @pl.when(layer == 0)
    def _():
        theta_vmem[...] = x_ref[...]

    x = theta_vmem[...]           # (B, L)  resident activation
    w1t = w1t_ref[...]            # (L, H)
    b1 = b1_ref[...]              # (1, H)
    w2t = w2t_ref[...]            # (H, L)
    b2 = b2_ref[...]              # (1, L)

    # Layer forward: Linear -> LeakyReLU(0.01) -> Linear (weights pre-transposed).
    pre1 = jnp.dot(x, w1t, preferred_element_type=jnp.float32) + b1      # (B, H)
    h = jnp.where(pre1 > 0, pre1, 0.01 * pre1)
    out = jnp.dot(h, w2t, preferred_element_type=jnp.float32) + b2       # (B, L)
    theta_vmem[...] = out
    theta_ref[...] = out          # resident output block; flushed once at the end

    # Analytic (transposed) Jacobian evaluated at the layer OUTPUT, matching the
    # reference's jacobian(layer, theta_u) called *after* the update.
    pre2 = jnp.dot(out, w1t, preferred_element_type=jnp.float32) + b1    # (B, H)
    d = jnp.where(pre2 > 0, jnp.float32(1.0), jnp.float32(0.01))         # (B, H)

    # left[b*L + i, h] = d[b, h] * w1t[i, h]
    # jt[b*L + i, j]   = sum_h d[b,h] w1t[i,h] w2t[h,j] = (J_b)^T[i, j]
    # One batched (B*L, H) x (H, L) matmul + one store for all samples.
    m = d[:, None, :] * w1t[None, :, :]                                  # (B, L, H)
    jt = jnp.dot(m.reshape(batch * latent, -1), w2t,
                 preferred_element_type=jnp.float32)                     # (B*L, L)
    jac_ref[...] = jt
    # TODO(synk): if L were ever scaled up, emit jac lane-dense ((NL, B, L*L))
    # to avoid masked partial stores on the L(<128) lane axis.


def _flow_pallas(z_u, w1t, b1, w2t, b2):
    nl, L, H = w1t.shape
    B = z_u.shape[0]

    flops = nl * (3 * 2 * B * L * H + 2 * (B * L) * H * L + 6 * B * H)
    bytes_accessed = 4 * (2 * B * L + nl * (2 * L * H + H + L + B * L * L))

    theta_u, jac_flat = pl.pallas_call(
        functools.partial(_flow_kernel, batch=B, latent=L),
        grid_spec=pltpu.PrefetchScalarGridSpec(
            num_scalar_prefetch=0,
            grid=(nl,),
            in_specs=[
                pl.BlockSpec((B, L), lambda l: (0, 0)),            # z_u (loaded once)
                pl.BlockSpec((None, L, H), lambda l: (l, 0, 0)),   # w1t per layer
                pl.BlockSpec((None, 1, H), lambda l: (l, 0, 0)),   # b1
                pl.BlockSpec((None, H, L), lambda l: (l, 0, 0)),   # w2t
                pl.BlockSpec((None, 1, L), lambda l: (l, 0, 0)),   # b2
            ],
            out_specs=(
                pl.BlockSpec((B, L), lambda l: (0, 0)),            # theta_u (resident)
                pl.BlockSpec((None, B * L, L), lambda l: (l, 0, 0)),  # Jacobians
            ),
            scratch_shapes=[pltpu.VMEM((B, L), jnp.float32)],      # carried activation
        ),
        out_shape=(
            jax.ShapeDtypeStruct((B, L), jnp.float32),
            jax.ShapeDtypeStruct((nl, B * L, L), jnp.float32),
        ),
        compiler_params=pltpu.CompilerParams(
            dimension_semantics=("arbitrary",)),                   # layer axis carries state
        cost_estimate=pl.CostEstimate(flops=flops, transcendentals=0,
                                      bytes_accessed=bytes_accessed),
    )(z_u.astype(jnp.float32), w1t, b1, w2t, b2)

    return theta_u, jac_flat.reshape(nl, B, L, L)


@functools.partial(jax.jit, static_argnames=("latent_dim",))
def invertible_mlp_flow_forward(z_u, params, latent_dim):
    w1t, b1, w2t, b2 = params
    nl = w1t.shape[0]

    theta_u, jac = _flow_pallas(z_u, w1t, b1, w2t, b2)

    # TODO(synk): slogdet (LU with partial pivoting) has no clean Pallas
    # equivalent; computed once, batched over (num_layers, B), in plain JAX
    # on the kernel's Jacobian stack. det(J^T) == det(J) so logabsdet matches.
    _, logabsdet = jnp.linalg.slogdet(jac)                    # (NL, B) float32
    lad16 = logabsdet.astype(jnp.float16)                     # matches .half()
    per_layer = jax.scipy.special.logsumexp(lad16, axis=1).astype(jnp.float16)

    log_det_jacobian = jnp.float16(0.0)
    for i in range(nl):                                       # sequential fp16 adds, as in the ref
        log_det_jacobian = log_det_jacobian + per_layer[i]

    theta = theta_u[:, :latent_dim]
    return theta, log_det_jacobian


def init_params(key, latent_dim, hidden_dim, num_layers):
    """Deterministic synthetic init mirroring the module's __init__ shapes.

    Linear1: default-ish uniform init; Linear2 weight: orthogonal rows with
    gain 0.1 (as nn.init.orthogonal_(..., gain=0.1)). Returned stacked,
    pre-transposed and cast to f32 once (kernel never transposes)."""
    w1t_l, b1_l, w2t_l, b2_l = [], [], [], []
    for i in range(num_layers):
        k = jax.random.fold_in(key, i)
        k1, k2, k3, k4 = jax.random.split(k, 4)
        bound1 = 1.0 / float(latent_dim) ** 0.5
        w1 = jax.random.uniform(k1, (hidden_dim, latent_dim), jnp.float32,
                                -bound1, bound1)
        b1 = jax.random.uniform(k2, (hidden_dim,), jnp.float32, -bound1, bound1)

        a = jax.random.normal(k3, (hidden_dim, latent_dim), jnp.float32)
        q, r = jnp.linalg.qr(a)                      # q: (H, L), orthonormal cols
        q = q * jnp.sign(jnp.diagonal(r))[None, :]
        w2 = 0.1 * q.T                               # (L, H), orthonormal rows * gain

        bound2 = 1.0 / float(hidden_dim) ** 0.5
        b2 = jax.random.uniform(k4, (latent_dim,), jnp.float32, -bound2, bound2)

        w1t_l.append(w1.T)                           # (L, H)
        b1_l.append(b1.reshape(1, -1))               # (1, H)
        w2t_l.append(w2.T)                           # (H, L)
        b2_l.append(b2.reshape(1, -1))               # (1, L)

    return (jnp.stack(w1t_l).astype(jnp.float32),
            jnp.stack(b1_l).astype(jnp.float32),
            jnp.stack(w2t_l).astype(jnp.float32),
            jnp.stack(b2_l).astype(jnp.float32))


if __name__ == "__main__":
    latent_dim, hidden_dim, num_layers = 8, 32, 3
    batch = 8

    key = jax.random.PRNGKey(0)
    kz, kp = jax.random.split(key)
    z_u = jax.random.normal(kz, (batch, latent_dim), jnp.float32)
    params = init_params(kp, latent_dim, hidden_dim, num_layers)

    theta, log_det = invertible_mlp_flow_forward(z_u, params,
                                                 latent_dim=latent_dim)
    jax.block_until_ready((theta, log_det))
    assert theta.shape == (batch, latent_dim)
    assert log_det.dtype == jnp.float16
    print("KERNEL_OK")
</pallas_src>

<mosaic_0001>
module attributes {stable_mosaic.version = 11 : i64} {
  func.func @_flow_kernel(%arg0: i32, %arg1: memref<8x8xf32, #tpu.memory_space<vmem>>, %arg2: memref<1x8x32xf32, #tpu.memory_space<vmem>>, %arg3: memref<1x1x32xf32, #tpu.memory_space<vmem>>, %arg4: memref<1x32x8xf32, #tpu.memory_space<vmem>>, %arg5: memref<1x1x8xf32, #tpu.memory_space<vmem>>, %arg6: memref<8x8xf32, #tpu.memory_space<vmem>>, %arg7: memref<1x64x8xf32, #tpu.memory_space<vmem>>, %arg8: memref<8x8xf32, #tpu.memory_space<vmem>>) attributes {dimension_semantics = [#tpu.dimension_semantics<arbitrary>], iteration_bounds = array<i64: 3>, scalar_prefetch = 0 : i64, scratch_operands = 1 : i64, tpu.core_type = #tpu.core_type<tc>, window_params = [{pipeline_mode = #tpu.pipeline_mode<synchronous>, transform_indices = @transform_0, window_bounds = array<i64: 8, 8>}, {transform_indices = @transform_1, window_bounds = array<i64: 1, 8, 32>}, {transform_indices = @transform_2, window_bounds = array<i64: 1, 1, 32>}, {transform_indices = @transform_3, window_bounds = array<i64: 1, 32, 8>}, {transform_indices = @transform_4, window_bounds = array<i64: 1, 1, 8>}, {pipeline_mode = #tpu.pipeline_mode<synchronous>, transform_indices = @transform_5, window_bounds = array<i64: 8, 8>}, {transform_indices = @transform_6, window_bounds = array<i64: 1, 64, 8>}]} {
    %c0_i32 = arith.constant 0 : i32
    %0 = arith.cmpi eq, %arg0, %c0_i32 : i32
    %1 = arith.extui %0 : i1 to i32
    %c0_i32_0 = arith.constant 0 : i32
    %2 = arith.cmpi ne, %1, %c0_i32_0 : i32
    scf.if %2 {
      %c0_29 = arith.constant 0 : index
      %c0_30 = arith.constant 0 : index
      %43 = vector.load %arg1[%c0_29, %c0_30] : memref<8x8xf32, #tpu.memory_space<vmem>>, vector<8x8xf32>
      %c0_31 = arith.constant 0 : index
      %c0_32 = arith.constant 0 : index
      %44 = vector.load %arg8[%c0_31, %c0_32] : memref<8x8xf32, #tpu.memory_space<vmem>>, vector<8x8xf32>
      tpu.vector_store %arg8[%c0_31, %c0_32], %43 {strides = array<i32>} : memref<8x8xf32, #tpu.memory_space<vmem>>, vector<8x8xf32>,
    } else {
    }
    %c0 = arith.constant 0 : index
    %c0_1 = arith.constant 0 : index
    %3 = vector.load %arg8[%c0, %c0_1] : memref<8x8xf32, #tpu.memory_space<vmem>>, vector<8x8xf32>
    %c0_2 = arith.constant 0 : index
    %c0_3 = arith.constant 0 : index
    %c0_4 = arith.constant 0 : index
    %4 = vector.load %arg2[%c0_2, %c0_3, %c0_4] : memref<1x8x32xf32, #tpu.memory_space<vmem>>, vector<1x8x32xf32>
    %5 = vector.shape_cast %4 : vector<1x8x32xf32> to vector<8x32xf32>
    %c0_5 = arith.constant 0 : index
    %c0_6 = arith.constant 0 : index
    %c0_7 = arith.constant 0 : index
    %6 = vector.load %arg3[%c0_5, %c0_6, %c0_7] : memref<1x1x32xf32, #tpu.memory_space<vmem>>, vector<1x1x32xf32>
    %7 = vector.shape_cast %6 : vector<1x1x32xf32> to vector<1x32xf32>
    %c0_8 = arith.constant 0 : index
    %c0_9 = arith.constant 0 : index
    %c0_10 = arith.constant 0 : index
    %8 = vector.load %arg4[%c0_8, %c0_9, %c0_10] : memref<1x32x8xf32, #tpu.memory_space<vmem>>, vector<1x32x8xf32>
    %9 = vector.shape_cast %8 : vector<1x32x8xf32> to vector<32x8xf32>
    %c0_11 = arith.constant 0 : index
    %c0_12 = arith.constant 0 : index
    %c0_13 = arith.constant 0 : index
    %10 = vector.load %arg5[%c0_11, %c0_12, %c0_13] : memref<1x1x8xf32, #tpu.memory_space<vmem>>, vector<1x1x8xf32>
    %11 = vector.shape_cast %10 : vector<1x1x8xf32> to vector<1x8xf32>
    %cst = arith.constant dense<0.000000e+00> : vector<8x32xf32>
    %12 = tpu.matmul %3, %5, %cst {dimension_numbers = #tpu.dot_dimension_numbers<[1], [0], [0], [1], [0, 0, 1, 1], [], []>} : vector<8x8xf32>, vector<8x32xf32>, vector<8x32xf32> -> vector<8x32xf32>
    %13 = vector.broadcast %7 : vector<1x32xf32> to vector<8x32xf32>
    %14 = arith.addf %12, %13 : vector<8x32xf32>
    %cst_14 = arith.constant 0.000000e+00 : f32
    %15 = vector.broadcast %cst_14 : f32 to vector<8x32xf32>
    %16 = arith.cmpf ogt, %14, %15 : vector<8x32xf32>
    %cst_15 = arith.constant 0.00999999977 : f32
    %17 = vector.broadcast %cst_15 : f32 to vector<8x32xf32>
    %18 = arith.mulf %17, %14 : vector<8x32xf32>
    %19 = arith.select %16, %14, %18 : vector<8x32xi1>, vector<8x32xf32>
    %cst_16 = arith.constant dense<0.000000e+00> : vector<8x8xf32>
    %20 = tpu.matmul %19, %9, %cst_16 {dimension_numbers = #tpu.dot_dimension_numbers<[1], [0], [0], [1], [0, 0, 1, 1], [], []>} : vector<8x32xf32>, vector<32x8xf32>, vector<8x8xf32> -> vector<8x8xf32>
    %21 = vector.broadcast %11 : vector<1x8xf32> to vector<8x8xf32>
    %22 = arith.addf %20, %21 : vector<8x8xf32>
    %c0_17 = arith.constant 0 : index
    %c0_18 = arith.constant 0 : index
    %23 = vector.load %arg8[%c0_17, %c0_18] : memref<8x8xf32, #tpu.memory_space<vmem>>, vector<8x8xf32>
    tpu.vector_store %arg8[%c0_17, %c0_18], %22 {strides = array<i32>} : memref<8x8xf32, #tpu.memory_space<vmem>>, vector<8x8xf32>,
    %c0_19 = arith.constant 0 : index
    %c0_20 = arith.constant 0 : index
    %24 = vector.load %arg6[%c0_19, %c0_20] : memref<8x8xf32, #tpu.memory_space<vmem>>, vector<8x8xf32>
    tpu.vector_store %arg6[%c0_19, %c0_20], %22 {strides = array<i32>} : memref<8x8xf32, #tpu.memory_space<vmem>>, vector<8x8xf32>,
    %cst_21 = arith.constant dense<0.000000e+00> : vector<8x32xf32>
    %25 = tpu.matmul %22, %5, %cst_21 {dimension_numbers = #tpu.dot_dimension_numbers<[1], [0], [0], [1], [0, 0, 1, 1], [], []>} : vector<8x8xf32>, vector<8x32xf32>, vector<8x32xf32> -> vector<8x32xf32>
    %26 = vector.broadcast %7 : vector<1x32xf32> to vector<8x32xf32>
    %27 = arith.addf %25, %26 : vector<8x32xf32>
    %cst_22 = arith.constant 0.000000e+00 : f32
    %28 = vector.broadcast %cst_22 : f32 to vector<8x32xf32>
    %29 = arith.cmpf ogt, %27, %28 : vector<8x32xf32>
    %cst_23 = arith.constant 1.000000e+00 : f32
    %cst_24 = arith.constant 0.00999999977 : f32
    %30 = vector.broadcast %cst_23 : f32 to vector<8x32xf32>
    %31 = vector.broadcast %cst_24 : f32 to vector<8x32xf32>
    %32 = arith.select %29, %30, %31 : vector<8x32xi1>, vector<8x32xf32>
    %33 = vector.shape_cast %32 : vector<8x32xf32> to vector<8x1x32xf32>
    %34 = vector.shape_cast %5 : vector<8x32xf32> to vector<1x8x32xf32>
    %35 = vector.broadcast %33 : vector<8x1x32xf32> to vector<8x8x32xf32>
    %36 = vector.broadcast %34 : vector<1x8x32xf32> to vector<8x8x32xf32>
    %37 = arith.mulf %35, %36 : vector<8x8x32xf32>
    %38 = vector.shape_cast %37 : vector<8x8x32xf32> to vector<64x32xf32>
    %cst_25 = arith.constant dense<0.000000e+00> : vector<64x8xf32>
    %39 = tpu.matmul %38, %9, %cst_25 {dimension_numbers = #tpu.dot_dimension_numbers<[1], [0], [0], [1], [0, 0, 1, 1], [], []>} : vector<64x32xf32>, vector<32x8xf32>, vector<64x8xf32> -> vector<64x8xf32>
    %c0_26 = arith.constant 0 : index
    %c0_27 = arith.constant 0 : index
    %c0_28 = arith.constant 0 : index
    %40 = vector.load %arg7[%c0_26, %c0_27, %c0_28] : memref<1x64x8xf32, #tpu.memory_space<vmem>>, vector<1x64x8xf32>
    %41 = vector.shape_cast %40 : vector<1x64x8xf32> to vector<64x8xf32>
    %42 = vector.shape_cast %39 : vector<64x8xf32> to vector<1x64x8xf32>
    tpu.vector_store %arg7[%c0_26, %c0_27, %c0_28], %42 {strides = array<i32>} : memref<1x64x8xf32, #tpu.memory_space<vmem>>, vector<1x64x8xf32>,
    return
  }
  func.func @transform_0(%arg0: i32) -> (i32, i32) {
    %c0_i32 = arith.constant 0 : i32
    %c0_i32_0 = arith.constant 0 : i32
    %c0_i32_1 = arith.constant 0 : i32
    return %c0_i32, %c0_i32_0 : i32, i32
  }
  func.func @transform_1(%arg0: i32) -> (i32, i32, i32) {
    %c0_i32 = arith.constant 0 : i32
    %c0_i32_0 = arith.constant 0 : i32
    %c0_i32_1 = arith.constant 0 : i32
    return %arg0, %c0_i32, %c0_i32_0 : i32, i32, i32
  }
  func.func @transform_2(%arg0: i32) -> (i32, i32, i32) {
    %c0_i32 = arith.constant 0 : i32
    %c0_i32_0 = arith.constant 0 : i32
    %c0_i32_1 = arith.constant 0 : i32
    return %arg0, %c0_i32, %c0_i32_0 : i32, i32, i32
  }
  func.func @transform_3(%arg0: i32) -> (i32, i32, i32) {
    %c0_i32 = arith.constant 0 : i32
    %c0_i32_0 = arith.constant 0 : i32
    %c0_i32_1 = arith.constant 0 : i32
    return %arg0, %c0_i32, %c0_i32_0 : i32, i32, i32
  }
  func.func @transform_4(%arg0: i32) -> (i32, i32, i32) {
    %c0_i32 = arith.constant 0 : i32
    %c0_i32_0 = arith.constant 0 : i32
    %c0_i32_1 = arith.constant 0 : i32
    return %arg0, %c0_i32, %c0_i32_0 : i32, i32, i32
  }
  func.func @transform_5(%arg0: i32) -> (i32, i32) {
    %c0_i32 = arith.constant 0 : i32
    %c0_i32_0 = arith.constant 0 : i32
    %c0_i32_1 = arith.constant 0 : i32
    return %c0_i32, %c0_i32_0 : i32, i32
  }
  func.func @transform_6(%arg0: i32) -> (i32, i32, i32) {
    %c0_i32 = arith.constant 0 : i32
    %c0_i32_0 = arith.constant 0 : i32
    %c0_i32_1 = arith.constant 0 : i32
    return %arg0, %c0_i32, %c0_i32_0 : i32, i32, i32
  }
}

</mosaic_0001>

<bundles_post_ra>
// kernel: custom-call.2
= control target key start
LH: loop header
LB: loop body
LE: loop exit
PB: predicated region body
PF: predicated region fallthrough
CT: control target
= control target key end

     0   :  { %s1056_s0 = inlined_call_operand.vmem [shape: f32[3,8,8,8], index: 0, kind: input, shape index: {}]   ;;  %s1057_s1 = inlined_call_operand.vmem [shape: f32[3,8,8,8], index: 1, kind: output, shape index: {0}]   ;;  %s1058_s2 = inlined_call_operand.hbm [shape: s32[3,8,8], index: 2, kind: output, shape index: {1}]   ;;  %s1059_s3 = inlined_call_operand.hbm [shape: s32[3,8,8], index: 3, kind: output, shape index: {2}]  }
   0x1   :  { %1064 = sst [smem:[#allocation13_spill]] %s1056_s0 }
   0x2   :  { %5 = vsyncpa [#allocation3], 0 }
   0x3   :  { %7 = vsyncpa [#allocation3 + $0x1], 0 }
   0x4   :  { %8 = vsyncpa [#allocation5], 0 }
   0x5   :  { %10 = vsyncpa [#allocation5 + $0x1], 0  ;;  %s842_s12 = smov 0   ;;  %s844_s13 = smov 0  }
   0x6   :  { %s846_s14 = smov 0   ;;  %s848_s15 = smov 0  }
   0x7   :  { %s850_s16 = smov 0   ;;  %s852_s17 = smov 0  }
   0x8   :  { %s854_s18 = smov 0   ;;  %s856_s19 = smov 0  }
   0x9 LB: > { %1065 = sst [smem:[#allocation9_spill]] %s807_s17  ;;  %s574_s20 = sadd.s32 4294967295, %s815_s19   ;;  %s815_s19 = sphi %s856_s19, %s16_s19   ;;  %s811_s18 = sphi %s854_s18, %s1075_s18   ;;  %s807_s17 = sphi %s852_s17, %s1074_s17   ;;  %s803_s16 = sphi %s850_s16, %s1073_s16   ;;  %s799_s15 = sphi %s848_s15, %s1072_s15   ;;  %s795_s14 = sphi %s846_s14, %s1078_s14   ;;  %s791_s13 = sphi %s844_s13, %s1077_s13   ;;  %s787_s12 = sphi %s842_s12, %s1076_s12  }
   0xa   : > { %1066 = sst [smem:[#allocation10_spill]] %s811_s18  ;;  %s575_s21 = sadd.s32 4294967294, %s815_s19  }
   0xb   : > { %s25_s22 = sadd.s32 1, %s807_s17  ;;  %s28_s23 = sadd.s32 1, %s811_s18 }
   0xc   : > { %p26_p0 = scmp.ge.s32.totalorder %s25_s22, 8  ;;  %s32_s24 = sshrl.u32 %s807_s17, 3 }
   0xd   : > { %p49_p1 = scmp.ne.s32.totalorder %s795_s14, %s791_s13  ;;  %p50_p2 = scmp.eq.s32.totalorder %s574_s20, 23 }
   0xe   : > { %s1080_s22 = smov (%p26_p0, %s25_s22), 0  ;;  %s1082_s23 = smov (!%p26_p0, %s28_s23), %s811_s18 }
   0xf   : > { %1067 = sst [smem:[#allocation11_spill]] %s1080_s22  ;;  %s33_s25 = sshrl.u32 %s1080_s22, 3 }
  0x10   : > { %p30_p3 = scmp.ge.s32.totalorder %s1082_s23, 3  ;;  %s35_s26 = ssub.s32 %s32_s24, %s33_s25 }
  0x11   : > { %p895_p4 = por %p50_p2, %p49_p1  ;;  %p55_p5 = scmp.ne.s32.totalorder %s791_s13, %s787_s12 }
  0x12   : > { %s1084_s23 = smov (%p30_p3, %s1082_s23), 0  ;;  %p56_p6 = scmp.eq.s32.totalorder %s575_s21, 23 }
  0x13   : > { %1069 = sst [smem:[#allocation12_spill]] %s1084_s23  ;;  %s34_s28 = ssub.s32 %s811_s18, %s1084_s23 }
  0x14   : > { %s39_s29 = sadd.s32 1, %s795_s14  ;;  %s36_s30 = sor.u32 %s35_s26, %s34_s28 }
  0x15   : > { %p906_p7 = por %p56_p6, %p55_p5  ;;  %p37_p8 = scmp.eq.s32.totalorder %s36_s30, 0 }
  0x16   : > { %p577_p9 = scmp.ge.s32.totalorder %s815_s19, 24 }
  0x17   : > { %s911_s5 = scalar_select %p37_p8, %s795_s14, %s39_s29  }
  0x18   : > { %102 = sbr.rel (%p577_p9) target bundleno = 35 (0x23), region = 16  ;;  %s104_s6 = sand.u32 (!%p577_p9), 1, %s815_s19  }
  0x19   : > { %s579_s7 = sshll.u32 (!%p577_p9), %s811_s18, 3  ;;  %s578_s8 = sshll.u32 (!%p577_p9), %s104_s6, 3 }
  0x1a   : > { %s108_s9 = sadd.s32 (!%p577_p9), %s807_s17, %s579_s7  ;;  %s1071_s0 = sld [smem:[#allocation13_spill]] (!%p577_p9) }
  0x1b   : > { %s580_s10 = sshll.u32 (!%p577_p9), %s108_s9, 3  ;;  %s106_s25 = scalar_lea.vmem (!%p577_p9), [#allocation0], %s578_s8 }
  0x20   : > { %s110_s24 = scalar_lea.vmem %s1071_s0, %s580_s10 }
  0x21   : > { %v139_v0 = vld [vmem:[%s110_s24] sm:$0xff] }
  0x22   : > { %140 = vst [vmem:[%s106_s25] sm:$0xff] %v139_v0 }
  0x23 PF: > { %p581_p10 = scmp.ge.s32.totalorder %s815_s19, 1  ;;  %p145_p11 = scmp.lt.s32.totalorder %s815_s19, 25 }
  0x25   : > { %p146_p12 = pnand %p581_p10, %p145_p11 }
  0x27   : > { %149 = sbr.rel (%p146_p12) target bundleno = 477 (0x1dd), region = 54 }
  0x2c   : > { %s152_s26 = sand.u32 1, %s574_s20   ;;  %s925_s28 = sand.u32 1, %s791_s13   ;;  %v186_v1 = vlaneseq  ;;  %v821_v4 = vmov 0  }
  0x2d   : > { %s582_s29 = sshll.u32 %s152_s26, 3  ;;  %s584_s30 = sshll.u32 %s925_s28, 3 }
  0x2e   : > { %v929_v2 = vshrl.u32 %v186_v1, 7  ;;  %s154_s6 = scalar_lea.vmem [#allocation0], %s582_s29  ;;  %s931_s7 = scalar_lea.vmem [#allocation1], %s582_s29 }
  0x2f   : > { %v179_v3 = vld [vmem:[%s154_s6] sm:$0xff]  ;;  %s181_s8 = sand.u32 7, %s799_s15   ;;  %s935_s9 = scalar_lea.vmem [#allocation2], %s584_s30 }
  0x30   : > { %180 = vst [vmem:[%s931_s7] sm:$0xff] %v179_v3  ;;  %s938_s20 = scalar_lea.vmem %s935_s9, %s181_s8 [#allocation2]  ;;  %s940_s10 = scalar_lea.vmem [#allocation4], %s584_s30 }
  0x31   : > { %s943_s11 = scalar_lea.vmem %s940_s10, %s181_s8 [#allocation4]  ;;  %190 = vst [vmem:[#allocation6] sm:$0xff] %v929_v2  ;;  %s947_s21 = smov 0  }
  0x32   : > { %185 = vst [vmem:[%s938_s20] sm:$0x1] %v821_v4 }
  0x33 LB: >> { %v954_v7 = vstv %s819_s21  ;;  %s247_s24 = ssub.s32 128, %s819_s21  ;;  %s259_s25 = scalar_lea.vmem %s931_s7, %s819_s21 [#allocation1]  ;;  %v253_v38 = vand.u32 127, %v186_v1  ;;  %s819_s21 = sphi %s947_s21, %s196_s21  }
  0x34   : >> { %vm205_vm0 = vcmp.ge.s32.totalorder %v929_v2, %v954_v7  ;;  %s265_s30 = scalar_lea.vmem [#allocation6], %s819_s21  ;;  %vm285_vm12 = vcmp.gt.s32.totalorder %v929_v2, %v954_v7  ;;  %s196_s21 = sadd.s32 1, %s819_s21  }
  0x35   : >> { %vm254_vm10 = vcmp.eq.s32.totalorder %v253_v38, %v954_v7  ;;  %p193_p13 = scmp.ge.s32.totalorder %s196_s21, 8  }
  0x36   : > { %s412_s8 = sshrl.u32 (%p193_p13), %s799_s15, 3  ;;  %s363_s21 = scalar_lea.sflag (%p193_p13), [#allocation3], %s925_s28 }
  0x37   : >> { %v201_v5 = vld [vmem:[%s931_s7] sm:$0xff]  ;;  %v261_v39 = vld [vmem:[%s259_s25] ss:$0 sm:$0xff] }
  0x38   : >> { %v202_v6 = vand.u32 2147483647, %v201_v5  ;;  %v267_v43 = vld [vmem:[%s265_s30] ss:$0 sm:$0xff] }
  0x39   : >> { %v256_v41 = vld [vmem:[%s938_s20] ss:$0 sm:$0xff] }
  0x3a   : >> { %vm586_vm1 = vcmp.gt.f32.partialorder %v202_v6, -inf }
  0x3b   : >> { %vm209_vm2 = vmand %vm205_vm0, %vm586_vm1 }
  0x3c   : >> { %v210_v8 = vsel %vm209_vm2, %v929_v2, %v954_v7  ;;  %v211_v9 = vsel %vm209_vm2, %v202_v6, -inf  ;;  %vm302_vm2 = vmand %vm285_vm12, %vm254_vm10 }
  0x3d   : >> { %v212_v10 = vrot.slane %v211_v9, 1  ;;  %v213_v11 = vrot.slane %v210_v8, 1 }
  0x3f   : >> { %vm214_vm3 = vcmp.ge.f32.partialorder %v212_v10, %v211_v9  ;;  %v217_v12 = vrot.slane %v212_v10, 1  ;;  %v218_v13 = vrot.slane %v213_v11, 1 }
  0x40   : >> { %v215_v14 = vsel %vm214_vm3, %v212_v10, %v211_v9  ;;  %v216_v15 = vsel %vm214_vm3, %v213_v11, %v210_v8  ;;  %vm277_vm3 = vcmp.gt.s32.totalorder %v253_v38, %v954_v7 }
  0x41   : >> { %vm219_vm4 = vcmp.ge.f32.partialorder %v217_v12, %v215_v14  ;;  %v222_v16 = vrot.slane %v217_v12, 1  ;;  %v223_v17 = vrot.slane %v218_v13, 1 }
  0x42   : >> { %v220_v18 = vsel %vm219_vm4, %v217_v12, %v215_v14  ;;  %v221_v19 = vsel %vm219_vm4, %v218_v13, %v216_v15 }
  0x43   : >> { %vm224_vm5 = vcmp.ge.f32.partialorder %v222_v16, %v220_v18  ;;  %v227_v20 = vrot.slane %v222_v16, 1  ;;  %v228_v21 = vrot.slane %v223_v17, 1 }
  0x44   : >> { %v225_v22 = vsel %vm224_vm5, %v222_v16, %v220_v18  ;;  %v226_v23 = vsel %vm224_vm5, %v223_v17, %v221_v19 }
  0x45   : >> { %vm229_vm6 = vcmp.ge.f32.partialorder %v227_v20, %v225_v22  ;;  %v232_v24 = vrot.slane %v227_v20, 1  ;;  %v233_v25 = vrot.slane %v228_v21, 1 }
  0x46   : >> { %v230_v26 = vsel %vm229_vm6, %v227_v20, %v225_v22  ;;  %v231_v27 = vsel %vm229_vm6, %v228_v21, %v226_v23 }
  0x47   : >> { %vm234_vm7 = vcmp.ge.f32.partialorder %v232_v24, %v230_v26  ;;  %v237_v28 = vrot.slane %v232_v24, 1  ;;  %v238_v29 = vrot.slane %v233_v25, 1 }
  0x48   : >> { %v235_v30 = vsel %vm234_vm7, %v232_v24, %v230_v26  ;;  %v236_v31 = vsel %vm234_vm7, %v233_v25, %v231_v27 }
  0x49   : >> { %vm239_vm8 = vcmp.ge.f32.partialorder %v237_v28, %v235_v30  ;;  %v242_v32 = vrot.slane %v237_v28, 1  ;;  %v243_v33 = vrot.slane %v238_v29, 1 }
  0x4a   : >> { %v240_v34 = vsel %vm239_vm8, %v237_v28, %v235_v30  ;;  %v241_v35 = vsel %vm239_vm8, %v238_v29, %v236_v31 }
  0x4b   : >> { %vm244_vm9 = vcmp.ge.f32.partialorder %v242_v32, %v240_v34 }
  0x4c   : >> { %v246_v36 = vsel %vm244_vm9, %v243_v33, %v241_v35 }
  0x4d   : >> { %248 = vrot.lane.b32.xlu0 %v246_v36, %s247_s24  ;;  %s415_s24 = sadd.s32 (%p193_p13), %s803_s16, %s412_s8  ;;  %s705_s8 = scalar_lea.hbm (%p193_p13), %s1058_s2, 24 }
  0xbf   : >> { %v249_v37 = vpop.permute.xlu0 %248 }
  0xc0   : >> { %596 = vpush %v249_v37 }
  0xf1   : >> { %s597_s26 = spop %596 }
  0xf2   : >> { %v255_v40 = vstv %s597_s26  ;;  %s260_s29 = scalar_lea.vmem %s931_s7, %s597_s26 [#allocation1]  ;;  %s266_s6 = scalar_lea.vmem [#allocation6], %s597_s26 }
  0xf3   : >> { %v262_v42 = vld [vmem:[%s260_s29] ss:$0 sm:$0xff]  ;;  %v257_v45 = vsel %vm254_vm10, %v255_v40, %v256_v41 }
  0xf4   : >> { %v268_v44 = vld [vmem:[%s266_s6] ss:$0 sm:$0xff]  ;;  %263 = vst [vmem:[%s260_s29] sm:$0x1] %v261_v39  ;;  %vm271_vm11 = vcmp.ne.f32.partialorder %v262_v42, 0.0  ;;  %v278_v61 = vsel %vm277_vm3, %v262_v42, 0.0 }
  0xf5   : >> { %264 = vst [vmem:[%s259_s25] sm:$0x1] %v262_v42  ;;  %vm272_vm13 = vmand %vm254_vm10, %vm271_vm11  ;;  %s592_s25 = sshll.u32 (%p193_p13), %s415_s24, 3 }
  0xf6   : >> { %269 = vst [vmem:[%s266_s6] sm:$0x1] %v267_v43  ;;  %v273_v46 = vsel %vm272_vm13, %v262_v42, 1.0  ;;  %s419_s6 = sshll.u32 (%p193_p13), %s935_s9, 4  ;;  %s420_s6 = int_to_ptr.vmem [resolvable:$true] %s419_s6 }
  0xf7   : >> { %270 = vst [vmem:[%s265_s30] sm:$0x1] %v268_v44  ;;  %v286_v47 = vsel %vm285_vm12, %v273_v46, 1.0  ;;  %s417_s30 = scalar_lea.hbm (%p193_p13), %s1058_s2, %s592_s25 }
  0xf8   : >> { %683 = vrcp.f32 %v286_v47  ;;  %258 = vst [vmem:[%s938_s20] sm:$0x1] %v257_v45  ;;  %v298_v51 = vand.u32 2147483648, %v286_v47  ;;  %v296_v53 = vand.u32 2147483647, %v286_v47  ;;  %vm292_vm15 = vweird.f32 %v286_v47  ;;  %s421_s0 = sshll.u32 (%p193_p13), %s417_s30, 4  ;;  %s422_s0 = int_to_ptr.hbm [resolvable:$true] %s421_s0 }
  0xf9   : > { %s699_s23 = sshra.s32 (%p193_p13), %s422_s0, 4  ;;  %s700_s23 = int_to_ptr.hbm [resolvable:$true] %s699_s23 }
  0xfa   : >> { %v299_v55 = vor.u32 1.1754944e-38, %v298_v51  ;;  %vm297_vm1 = vcmp.eq.f32.partialorder %v296_v53, 8.507059e+37  ;;  %s701_s20 = scalar_lea.hbm (%p193_p13), %s700_s23, 8  ;;  %p706_p3 = scmp.lt.s32.totalorder (%p193_p13), %s700_s23, %s1058_s2 }
  0xfb   : > { %p702_p0 = scmp.ne.s32.totalorder (%p193_p13), %s700_s23, %s701_s20  ;;  %p707_p5 = scmp.lt.s32.totalorder (%p193_p13), %s705_s8, %s701_s20 }
  0xfc   : >> { %v282_v57 = vld [vmem:[%s931_s7] sm:$0xff] }
  0xfd   : > { %p703_p1 = pnand (%p193_p13), %p702_p0, %p895_p4  ;;  %p708_p6 = por (%p193_p13), %p707_p5, %p706_p3 }
  0xfe   : >> { %v684_v48 = vpop.eup %683  ;;  %v309_v3 = vld [vmem:[#allocation6] sm:$0xff] (%p193_p13) }
  0xff   : >> { %v288_v49 = vmul.f32 %v684_v48, %v286_v47  ;;  %vm293_vm14 = vweird.f32 %v684_v48  ;;  %p704_p2 = pneg (%p193_p13), %p703_p1 }
 0x100   : >> { %vm294_vm0 = vmor %vm292_vm15, %vm293_vm14 }
 0x101   : >> { %v289_v50 = vsub.f32 1.0, %v288_v49  ;;  %p709_p8 = pnand (%p193_p13), %p708_p6, %p704_p2 }
 0x103   : >> { %v290_v52 = vmul.f32 %v684_v48, %v289_v50 }
 0x105   : >> { %v291_v54 = vadd.f32 %v684_v48, %v290_v52 }
 0x107   : >> { %v295_v56 = vsel %vm294_vm0, %v684_v48, %v291_v54 }
 0x108   : >> { %v300_v58 = vsel %vm297_vm1, %v299_v55, %v295_v56 }
 0x109   : >> { %v301_v59 = vmul.f32 %v300_v58, %v282_v57 }
 0x10b   : >> { %v303_v60 = vsel %vm302_vm2, %v301_v59, 0.0 }
 0x10c   : >> { %304 = vadd.xlane.f32.xlu0 %v303_v60 }
 0x135   : > { %325 = vxpose.xlu0.b32.start.end [1/1] (short) (narrow) (%p193_p13), %v309_v3, 8 }
 0x17f   : >> { %v305_v62 = vpop.xlane.xlu0 %304 }
 0x180   : >> { %v306_v63 = vmul.f32 %v305_v62, %v278_v61  ;;  %195 = sbr.rel (!%p193_p13) target bundleno = 51 (0x33), region = 181 }
 0x182   : >> { %v307_v0 = vsub.f32 %v301_v59, %v306_v63 }
 0x184   : >> { %308 = vst [vmem:[%s931_s7] sm:$0xff] %v307_v0 }
 0x185   : > { %712 = shalt.err (!%p709_p8)
}
 0x186   : > { %598 = dma.vmem_to_hbm [thread:$0]  (%p895_p4), %s420_s6, 128, %s422_s0, %s363_s21  }
 0x187   : > { %s590_s9 = sshll.u32 %s803_s16, 3  ;;  %s433_s20 = scalar_lea.hbm %s1059_s3, %s592_s25 }
 0x188   : > { %s373_s18 = sadd.s32 %s799_s15, %s590_s9  ;;  %s435_s8 = sshll.u32 %s940_s10, 4  ;;  %s436_s8 = int_to_ptr.vmem [resolvable:$true] %s435_s8 }
 0x189   : > { %s591_s22 = sshll.u32 %s373_s18, 3  ;;  %s437_s24 = sshll.u32 %s433_s20, 4  ;;  %s438_s24 = int_to_ptr.hbm [resolvable:$true] %s437_s24 }
 0x18a   : > { %s375_s17 = scalar_lea.vmem %s1057_s1, %s591_s22  ;;  %s368_s0 = scalar_lea.sflag [#allocation5], %s925_s28 }
 0x18b   : > { %v404_v1 = vld [vmem:[%s931_s7] sm:$0xff]  ;;  %s727_s15 = sshra.s32 %s438_s24, 4  ;;  %s733_s21 = scalar_lea.hbm %s1059_s3, 24  ;;  %s728_s15 = int_to_ptr.hbm [resolvable:$true] %s727_s15 }
 0x18c   : > { %405 = vst [vmem:[%s375_s17] sm:$0xff] %v404_v1  ;;  %s729_s16 = scalar_lea.hbm %s728_s15, 8  ;;  %p734_p12 = scmp.lt.s32.totalorder %s728_s15, %s1059_s3 }
 0x18d   : > { %p730_p9 = scmp.ne.s32.totalorder %s728_s15, %s729_s16  ;;  %p735_p13 = scmp.lt.s32.totalorder %s733_s21, %s729_s16 }
 0x18f   : > { %p731_p10 = pnand %p730_p9, %p895_p4  ;;  %p736_p0 = por %p735_p13, %p734_p12 }
 0x191   : > { %p732_p11 = pneg %p731_p10 }
 0x193   : > { %p737_p1 = pnand %p736_p0, %p732_p11 }
 0x1d9   : > { %v341_v2 = vpop.trf.xlu0 }
 0x1da   : > { %357 = vst [vmem:[%s943_s11] sm:$0x1] %v341_v2 }
 0x1db   : > { %740 = shalt.err (!%p737_p1)
}
 0x1dc   : > { %599 = dma.vmem_to_hbm [thread:$0]  (%p895_p4), %s436_s8, 128, %s438_s24, %s368_s0  }
 0x1dd PF: > { %p609_p2 = scmp.ge.s32.totalorder %s815_s19, 2  ;;  %s453_s28 = sand.u32 1, %s787_s12  }
 0x1de   : > { %s454_s10 = scalar_lea.sflag [#allocation3], %s453_s28 }
 0x1df   : > { %p603_p3 = pnand %p609_p2, %p906_p7 }
 0x1e1   : > { %p604_p5 = pneg %p603_p3 }
 0x1e3   : > { %778 = dma.done.wait (%p604_p5), %s454_s10, 128  }
 0x1e4   : > { %780 = vsyncadd (%p604_p5), %s454_s10, 4294967168  ;;  %s464_s11 = scalar_lea.sflag [#allocation5], %s453_s28 }
 0x1e5   : > { %782 = dma.done.wait (%p604_p5), %s464_s11, 128  }
 0x1e6   : > { %784 = vsyncadd (%p604_p5), %s464_s11, 4294967168  ;;  %s16_s19 = sadd.s32 1, %s815_s19   ;;  %s1072_s15 = sld [smem:[#allocation9_spill]] }
 0x1e7   : > { %p13_p6 = scmp.ge.s32.totalorder %s16_s19, 26   ;;  %s1073_s16 = sld [smem:[#allocation10_spill]] }
 0x1e8   : > { %s1074_s17 = sld [smem:[#allocation11_spill]]  ;;  %s1076_s12 = smov %s791_s13 }
 0x1e9   : > { %s1075_s18 = sld [smem:[#allocation12_spill]]  ;;  %s1077_s13 = smov %s795_s14 }
 0x1ea   : > { %s1078_s14 = smov %s911_s5  ;;  %15 = sbr.rel (!%p13_p6) target bundleno = 9 (0x9), region = 192 }
 0x1ef   :  { %470 = vsyncpa [#allocation3], 1 }
 0x1f0   :  { %472 = vsyncpa [#allocation3 + $0x1], 1 }
 0x1f1   :  { %473 = vsyncpa [#allocation5], 1 }
 0x1f2   :  { %475 = vsyncpa [#allocation5 + $0x1], 1 }

// kernel: invertible_mlp_flow_forward.1
= control target key start
LH: loop header
LB: loop body
LE: loop exit
PB: predicated region body
PF: predicated region fallthrough
CT: control target
= control target key end

     0   :  { %12 = vsyncpa [#allocation4], 0  ;;  %s742_s21 = smov 0   ;;  %s846_s0 = inlined_call_operand.vmem [shape: f32[8,8], index: 0, kind: input, shape index: {}]   ;;  %s847_s1 = inlined_call_operand.vmem [shape: f32[3,8,32], index: 1, kind: input, shape index: {}]   ;;  %s848_s2 = inlined_call_operand.vmem [shape: f32[3,1,32], index: 2, kind: input, shape index: {}]   ;;  %s849_s3 = inlined_call_operand.vmem [shape: f32[3,32,8], index: 3, kind: input, shape index: {}]   ;;  %s850_s4 = inlined_call_operand.vmem [shape: f32[3,1,8], index: 4, kind: input, shape index: {}]   ;;  %s851_s5 = inlined_call_operand.hbm [shape: f32[8,8], index: 5, kind: output, shape index: {0}]   ;;  %s852_s6 = inlined_call_operand.vmem [shape: f32[3,64,8], index: 6, kind: output, shape index: {1}]  }
   0x1 LB: > { %s748_s22 = sadd.s32 4294967295, %s703_s21   ;;  %p615_p0 = scmp.ge.s32.totalorder %s703_s21, 1  ;;  %s703_s21 = sphi %s742_s21, %s18_s21  }
   0x2   : > { %p236_p1 = scmp.lt.s32.totalorder %s703_s21, 4 }
   0x4   : > { %p237_p2 = pnand %p615_p0, %p236_p1 }
   0x5   : > { %p276_p3 = scmp.lt.s32.totalorder (!%p237_p2), %s748_s22, 2  ;;  %p621_p4 = scmp.ne.s32.totalorder (!%p237_p2), %s748_s22, 0 }
   0x6   : > { %240 = sbr.rel (%p237_p2) target bundleno = 583 (0x247), region = 40 }
   0xb   : > { %s754_s23 = scalar_select %p276_p3, %s748_s22, 2 }
   0xd   : > { %s616_s24 = sshll.u32 %s754_s23, 3  ;;  %s282_s27 = scalar_lea.vmem %s848_s2, %s754_s23 }
   0xe   : > { %s279_s30 = scalar_lea.vmem %s847_s1, %s616_s24  ;;  %s637_s7 = sshll.u32 %s754_s23, 5 }
   0xf   : > { %s287_s10 = scalar_lea.vmem %s849_s3, %s637_s7  ;;  %s290_s13 = scalar_lea.vmem %s850_s4, %s754_s23 }
  0x10   : > { %s638_s14 = sshll.u32 %s754_s23, 6  ;;  %299 = sbr.rel (%p621_p4) target bundleno = 23 (0x17), region = 44 }
  0x11   : > { %s776_s17 = scalar_lea.vmem %s852_s6, %s638_s14 }
  0x15   : > { %v300_v0 = vld [vmem:[%s846_s0] sm:$0xff]  ;;  %vm301_vm0 = vcmask 64512  }
  0x16   : > { %302 = vst.msk [vmem:[#allocation2] sm:$0xff] %vm301_vm0, %v300_v0 }
  0x17 PF: > { %v782_v1 = vld [vmem:[%s279_s30] sm:$0xff]  ;;  %vm314_vm1 = vcmask 64512   ;;  %v309_v3 = vld [vmem:[%s287_s10 + $0x18] sm:$0xff]  ;;  %v308_v4 = vld [vmem:[%s287_s10 + $0x10] sm:$0xff]  ;;  %vm344_vm3 = vcmask 261120   ;;  %p651_p5 = scmp.eq.s32.totalorder %s748_s22, 2 }
  0x18   : > { %333 = vmatpush.msra.mxu1 %v782_v1  ;;  %388 = vmatpush.msra.mxu2 %v782_v1  ;;  %v307_v5 = vld [vmem:[%s287_s10 + $0x8] sm:$0xff]  ;;  %v306_v6 = vld [vmem:[%s287_s10] sm:$0xff]  ;;  %v705_v17 = vmov 0.01   ;;  %s706_s23 = smov [#allocation3]   ;;  %s513_s30 = sshll.u32 %s851_s5, 4  ;;  %s514_s30 = int_to_ptr.hbm [resolvable:$true] %s513_s30 }
  0x19   : > { %463 = vmatpush.msra.mxu0 %v309_v3  ;;  %640 = vmatpush.msra.mxu3 %v309_v3  ;;  %v663_v7 = vld [vmem:[%s282_s27] ss:$0 sm:$0xff]  ;;  %s511_s27 = sshll.u32 %s706_s23, 4  ;;  %s512_s27 = int_to_ptr.vmem [resolvable:$true] %s511_s27 }
  0x1a   : > { %360 = vmatpush.msrb.mxu1 %v309_v3  ;;  %639 = vmatpush.msrb.mxu2 %v309_v3  ;;  %v664_v12 = vld [vmem:[%s290_s13] ss:$0 sm:$0xff] }
  0x1b   : > { %464 = vmatpush.msra.mxu0 %v308_v4  ;;  %642 = vmatpush.msra.mxu3 %v308_v4 }
  0x1c   : > { %361 = vmatpush.msrb.mxu1 %v308_v4  ;;  %641 = vmatpush.msrb.mxu2 %v308_v4 }
  0x1d   : > { %v303_v2 = vld [vmem:[#allocation2] sm:$0xff]  ;;  %465 = vmatpush.msra.mxu0 %v307_v5  ;;  %644 = vmatpush.msra.mxu3 %v307_v5 }
  0x1e   : > { %622 = vmatmul.msk.f32.vlgmr.msra.gmra.mxu1 %vm314_vm1, %v303_v2  ;;  %643 = vmatpush.msrb.mxu2 %v307_v5 }
  0x1f   : > { %362 = vmatpush.msrb.mxu1 %v307_v5  ;;  %466 = vmatpush.msra.mxu0 %v306_v6 }
  0x20   : > { %645 = vmatpush.msrb.mxu2 %v306_v6  ;;  %646 = vmatpush.msra.mxu3 %v306_v6 }
  0x21   : > { %363 = vmatpush.msrb.mxu1 %v306_v6 }
  0x9b   : > { %v335_v8 = vpop.f32.mrf.mxu1 }
  0x9c   : > { %v336_v9 = vadd.f32 %v663_v7, %v335_v8 }
  0x9e   : > { %vm338_vm2 = vcmp.gt.f32.partialorder %v336_v9, 0.0  ;;  %v339_v10 = vmul.f32 0.01, %v336_v9 }
  0xa0   : > { %v340_v11 = vsel %vm338_vm2, %v336_v9, %v339_v10 }
  0xa1   : > { %623 = vmatmul.msk.f32.vlgmr.msrb.gmra.mxu1 %vm344_vm3, %v340_v11 }
 0x11e   : > { %v365_v13 = vpop.f32.mrf.mxu1 }
 0x11f   : > { %v366_v14 = vadd.f32 %v664_v12, %v365_v13 }
 0x121   : > { %368 = vst.msk [vmem:[#allocation2] sm:$0xff] %vm314_vm1, %v366_v14  ;;  %624 = vmatmul.msk.f32.vlgmr.msra.gmra.mxu2 %vm314_vm1, %v366_v14 }
 0x122   : > { %369 = vst.msk [vmem:[#allocation3] sm:$0xff] %vm314_vm1, %v366_v14 }
 0x123   : > { %648 = dma.vmem_to_hbm [thread:$0]  (%p651_p5), %s512_s27, 128, %s514_s30, [#allocation4]  }
 0x1a4   : > { %v390_v15 = vpop.f32.mrf.mxu2 }
 0x1a5   : > { %v391_v16 = vadd.f32 %v663_v7, %v390_v15 }
 0x1a7   : > { %vm393_vm4 = vcmp.gt.f32.partialorder %v391_v16, 0.0 }
 0x1a8   : > { %v394_v18 = vsel %vm393_vm4, 1.0, %v705_v17 }
 0x1a9   : > { %v403_v19 = vperm.slane %v394_v18, 0  ;;  %v398_v20 = vrot.slane %v394_v18, 3  ;;  %v400_v21 = vrot.slane %v394_v18, 5  ;;  %v396_v25 = vrot.slane %v394_v18, 1 }
 0x1aa   : > { %v399_v28 = vrot.slane %v394_v18, 4  ;;  %v401_v29 = vrot.slane %v394_v18, 6  ;;  %v397_v34 = vrot.slane %v394_v18, 2  ;;  %v402_v37 = vrot.slane %v394_v18, 7 }
 0x1ab   : > { %v419_v22 = vmul.f32 %v403_v19, %v782_v1  ;;  %v406_v23 = vperm.slane %v398_v20, 0  ;;  %v408_v24 = vperm.slane %v400_v21, 0  ;;  %v404_v30 = vperm.slane %v396_v25, 0 }
 0x1ac   : > { %v407_v31 = vperm.slane %v399_v28, 0  ;;  %v409_v32 = vperm.slane %v401_v29, 0  ;;  %v405_v38 = vperm.slane %v397_v34, 0  ;;  %v410_v39 = vperm.slane %v402_v37, 0 }
 0x1ad   : > { %625 = vmatmul.msk.f32.vlgmr.msra.gmra.mxu0 %vm344_vm3, %v419_v22  ;;  %v422_v26 = vmul.f32 %v406_v23, %v782_v1  ;;  %v424_v27 = vmul.f32 %v408_v24, %v782_v1  ;;  %v420_v33 = vmul.f32 %v404_v30, %v782_v1 }
 0x1ae   : > { %v423_v35 = vmul.f32 %v407_v31, %v782_v1  ;;  %v425_v36 = vmul.f32 %v409_v32, %v782_v1  ;;  %v421_v40 = vmul.f32 %v405_v38, %v782_v1  ;;  %v426_v41 = vmul.f32 %v410_v39, %v782_v1 }
 0x1af   : > { %628 = vmatmul.msk.f32.vlgmr.msrb.gmra.mxu2 %vm344_vm3, %v422_v26  ;;  %630 = vmatmul.msk.f32.vlgmr.msra.gmra.mxu3 %vm344_vm3, %v424_v27 }
 0x1b5   : > { %626 = vmatmul.msk.f32.gmra.mxu0 %vm344_vm3, %v420_v33 }
 0x1b7   : > { %629 = vmatmul.msk.f32.gmra.mxu2 %vm344_vm3, %v423_v35  ;;  %631 = vmatmul.msk.f32.gmra.mxu3 %vm344_vm3, %v425_v36 }
 0x1bd   : > { %627 = vmatmul.msk.f32.gmra.mxu0 %vm344_vm3, %v421_v40 }
 0x1bf   : > { %632 = vmatmul.msk.f32.gmra.mxu3 %vm344_vm3, %v426_v41 }
 0x22a   : > { %v468_v42 = vpop.f32.mrf.mxu0 }
 0x22b   : > { %492 = vst.msk [vmem:[%s776_s17] sm:$0xff] %vm314_vm1, %v468_v42 }
 0x232   : > { %v471_v43 = vpop.f32.mrf.mxu0  ;;  %v477_v44 = vpop.f32.mrf.mxu2 }
 0x233   : > { %493 = vst.msk [vmem:[%s776_s17 + $0x8] sm:$0xff] %vm314_vm1, %v471_v43  ;;  %v483_v45 = vpop.f32.mrf.mxu3 }
 0x234   : > { %495 = vst.msk [vmem:[%s776_s17 + $0x18] sm:$0xff] %vm314_vm1, %v477_v44 }
 0x235   : > { %497 = vst.msk [vmem:[%s776_s17 + $0x28] sm:$0xff] %vm314_vm1, %v483_v45 }
 0x23a   : > { %v474_v46 = vpop.f32.mrf.mxu0  ;;  %v480_v47 = vpop.f32.mrf.mxu2 }
 0x23b   : > { %494 = vst.msk [vmem:[%s776_s17 + $0x10] sm:$0xff] %vm314_vm1, %v474_v46  ;;  %v486_v48 = vpop.f32.mrf.mxu3 }
 0x23c   : > { %496 = vst.msk [vmem:[%s776_s17 + $0x20] sm:$0xff] %vm314_vm1, %v480_v47 }
 0x23d   : > { %498 = vst.msk [vmem:[%s776_s17 + $0x30] sm:$0xff] %vm314_vm1, %v486_v48 }
 0x243   : > { %v489_v49 = vpop.f32.mrf.mxu3 }
 0x244   : > { %499 = vst.msk [vmem:[%s776_s17 + $0x38] sm:$0xff] %vm314_vm1, %v489_v49 }
 0x245   : > { %698 = dma.done.wait (%p651_p5), [#allocation4], 128  }
 0x246   : > { %700 = vsyncadd (%p651_p5), [#allocation4], 4294967168 }
 0x247 PF: > { %s18_s21 = sadd.s32 1, %s703_s21  }
 0x248   : > { %p15_p6 = scmp.ge.s32.totalorder %s18_s21, 5  }
 0x24a   :  { %17 = sbr.rel (!%p15_p6) target bundleno = 1 (0x1), region = 92 }
 0x24f   :  { %538 = vsyncpa [#allocation4], 1 }
 0x250   :  { %540 = vsyncpa [#allocation4 + $0x1], 1 }

</bundles_post_ra>
